<compile_context>
chip_gen: v6e
topology: v6e:2x2x1
jax: 0.10.0
libtpu: 0.0.40
codegen_flags: <defaults>
</compile_context>

<pallas_src>
import functools

import jax
import jax.numpy as jnp
from jax.experimental import pallas as pl
from jax.experimental.pallas import tpu as pltpu


def _policy_head_kernel(x_ref, w1_ref, bias_ref, w2_ref, b2_ref, out_ref):
    # x_ref:    (NB, C, HW)   compute dtype (bf16 by default)
    # w1_ref:   (PC, C)       compute dtype, BN scale already folded in
    # bias_ref: (PC, 1, 1)    f32 folded BN bias
    # w2_ref:   (PC, HW, Lp)  compute dtype, FC weight (transposed, label-padded)
    # b2_ref:   (1, Lp)       f32 FC bias (label-padded)
    # out_ref:  (NB, Lp)      f32
    x = x_ref[...]
    w1 = w1_ref[...]
    pc = w1.shape[0]

    # 1x1 conv == matmul over channels. dot_general output order is (PC, NB, HW),
    # so no output transpose and the per-PC slices below are leading-axis slices.
    y = jnp.einsum("pc,nch->pnh", w1, x, preferred_element_type=jnp.float32)

    # Folded BN bias + ReLU in f32, then cast for the bf16 FC matmul.
    y = jnp.maximum(y + bias_ref[...], 0.0).astype(w2_ref.dtype)

    # Linear over the NCHW-flattened activation, as an unrolled per-PC
    # accumulation (weight pre-reshaped to (PC, HW, Lp) at prep time) -- avoids
    # the in-kernel (NB, PC, HW) -> (NB, PC*HW) relayout entirely.
    acc = jnp.dot(y[0], w2_ref[0], preferred_element_type=jnp.float32)
    for p in range(1, pc):
        acc = acc + jnp.dot(y[p], w2_ref[p], preferred_element_type=jnp.float32)

    out_ref[...] = (acc + b2_ref[...]).astype(out_ref.dtype)


def prepare_policy_head_params(params, board_h, board_w, compute_dtype=jnp.bfloat16):
    """One-time weight prep (hoisted out of the per-call forward path)."""
    w1 = jnp.asarray(params["conv_w"], jnp.float32)            # (PC, C)
    gamma = jnp.asarray(params["bn_gamma"], jnp.float32)
    beta = jnp.asarray(params["bn_beta"], jnp.float32)
    mean = jnp.asarray(params["bn_mean"], jnp.float32)
    var = jnp.asarray(params["bn_var"], jnp.float32)
    eps = params["bn_eps"]
    fc_w = jnp.asarray(params["fc_w"], jnp.float32)            # (L, PC*HW)
    fc_b = jnp.asarray(params["fc_b"], jnp.float32)            # (L,)

    pc = w1.shape[0]
    hw = board_h * board_w
    n_labels = fc_w.shape[0]
    lp = 128 * ((n_labels + 127) // 128)                       # lane-dense output

    inv = gamma / jnp.sqrt(var + eps)
    w1s = (w1 * inv[:, None]).astype(compute_dtype)            # BN scale folded into conv
    bias = (beta - mean * inv).reshape(pc, 1, 1).astype(jnp.float32)

    w2r = fc_w.T.reshape(pc, hw, n_labels)                     # NCHW flatten order
    b2 = fc_b
    if lp != n_labels:
        w2r = jnp.pad(w2r, ((0, 0), (0, 0), (0, lp - n_labels)))
        b2 = jnp.pad(b2, (0, lp - n_labels))
    w2r = w2r.astype(compute_dtype)
    b2 = b2.reshape(1, lp).astype(jnp.float32)

    return {"w1s": w1s, "bias": bias, "w2r": w2r, "b2": b2}


@functools.partial(jax.jit, static_argnames=("n_labels", "batch_block"))
def policy_head_forward(x_nchw, w1s, bias, w2r, b2, *, n_labels, batch_block=128):
    n, c, h, w = x_nchw.shape
    hw = h * w
    pc, hw_w, lp = w2r.shape
    assert hw_w == hw and w1s.shape == (pc, c)

    # NCHW -> (N, C, HW) is a free reshape; cast to the matmul dtype.
    # (In a fused inference graph the producer should emit bf16 directly.)
    x_c = x_nchw.reshape(n, c, hw).astype(w1s.dtype)

    nb = min(batch_block, n)
    if nb < n:
        nb = max(8, (nb // 8) * 8)   # out-tile sublane dim must be a multiple of 8
    steps = pl.cdiv(n, nb)
    n_pad = steps * nb
    if n_pad != n:
        x_c = jnp.pad(x_c, ((0, n_pad - n), (0, 0), (0, 0)))

    # Per-step VMEM footprint: double-buffered x/out tiles + resident weights.
    # Derived explicitly (v7x has 64 MiB physical VMEM vs 128 MiB on v5e/v6e).
    x_blk = 2 * nb * c * hw * x_c.dtype.itemsize
    out_blk = 2 * nb * lp * 4
    w_bytes = sum(int(a.size) * a.dtype.itemsize for a in (w1s, bias, w2r, b2))
    vmem_limit = int(min(max(2 * w_bytes + x_blk + out_blk + (2 << 20), 16 << 20),
                         60 << 20))

    flops = 2 * n_pad * pc * c * hw + 2 * n_pad * pc * hw * lp
    bytes_accessed = (n_pad * c * hw * x_c.dtype.itemsize + w_bytes + n_pad * lp * 4)

    grid_spec = pltpu.PrefetchScalarGridSpec(
        num_scalar_prefetch=0,
        grid=(steps,),
        in_specs=[
            pl.BlockSpec((nb, c, hw), lambda i: (i, 0, 0)),      # batch-tiled, pipelined
            pl.BlockSpec((pc, c), lambda i: (0, 0)),             # VMEM-resident weights
            pl.BlockSpec((pc, 1, 1), lambda i: (0, 0, 0)),
            pl.BlockSpec((pc, hw, lp), lambda i: (0, 0, 0)),
            pl.BlockSpec((1, lp), lambda i: (0, 0)),
        ],
        out_specs=pl.BlockSpec((nb, lp), lambda i: (i, 0)),
    )

    out = pl.pallas_call(
        _policy_head_kernel,
        out_shape=jax.ShapeDtypeStruct((n_pad, lp), jnp.float32),
        grid_spec=grid_spec,
        compiler_params=pltpu.CompilerParams(
            dimension_semantics=("parallel",),       # megacore split on v7x
            vmem_limit_bytes=vmem_limit,
        ),
        cost_estimate=pl.CostEstimate(
            flops=int(flops), transcendentals=0,
            bytes_accessed=int(bytes_accessed)),
    )(x_c, w1s, bias, w2r, b2)

    return out[:n, :n_labels]


def _reference(x_nchw, params):
    """Pure-JAX f32 reference mirroring the PyTorch eval-mode forward."""
    n = x_nchw.shape[0]
    y = jnp.einsum("pc,nchw->nphw", params["conv_w"], x_nchw)
    inv = params["bn_gamma"] / jnp.sqrt(params["bn_var"] + params["bn_eps"])
    y = (y - params["bn_mean"][None, :, None, None]) * inv[None, :, None, None] \
        + params["bn_beta"][None, :, None, None]
    y = jnp.maximum(y, 0.0)
    return y.reshape(n, -1) @ params["fc_w"].T + params["fc_b"]


if __name__ == "__main__":
    # Small shapes consistent with the module (select_policy_from_plane=False).
    batch = 12
    channels = 32
    policy_channels = 4
    board_h = board_w = 8
    n_labels = 200                      # deliberately NOT a multiple of 128 -> pads to 256
    nb_flatten = board_h * board_w * policy_channels

    key = jax.random.PRNGKey(0)
    kx, kw1, kg, kb, km, kv, kw2, kb2 = jax.random.split(key, 8)

    x = jax.random.normal(kx, (batch, channels, board_h, board_w), jnp.float32)
    params = {
        # Conv2d(channels, PC, 1x1, bias=False): weight (PC, C, 1, 1) -> (PC, C)
        "conv_w": 0.1 * jax.random.normal(kw1, (policy_channels, channels), jnp.float32),
        # BatchNorm2d(PC), eval-mode running stats
        "bn_gamma": 1.0 + 0.1 * jax.random.normal(kg, (policy_channels,), jnp.float32),
        "bn_beta": 0.1 * jax.random.normal(kb, (policy_channels,), jnp.float32),
        "bn_mean": 0.1 * jax.random.normal(km, (policy_channels,), jnp.float32),
        "bn_var": jnp.abs(1.0 + 0.1 * jax.random.normal(kv, (policy_channels,), jnp.float32)),
        "bn_eps": 1e-5,
        # Linear(nb_flatten, n_labels)
        "fc_w": 0.05 * jax.random.normal(kw2, (n_labels, nb_flatten), jnp.float32),
        "fc_b": 0.05 * jax.random.normal(kb2, (n_labels,), jnp.float32),
    }
    # TODO(synk): Dropout is identity here (p=0 / eval mode); training-mode dropout
    # would need pltpu.prng_* masking inside the kernel.

    # One-time weight prep (BN fold, FC reshape/pad, bf16 casts) -- hoisted.
    prep = prepare_policy_head_params(params, board_h, board_w,
                                      compute_dtype=jnp.bfloat16)

    # batch_block=8 -> 2-step batch grid, exercising the pipelined/padded path.
    out = policy_head_forward(x, prep["w1s"], prep["bias"], prep["w2r"], prep["b2"],
                              n_labels=n_labels, batch_block=8)
    out = jax.block_until_ready(out)

    ref = _reference(x, params)
    assert out.shape == (batch, n_labels)
    err = float(jnp.max(jnp.abs(out - ref)))
    assert err < 4e-2, f"max abs err {err} (bf16 matmul operands, f32 accumulate)"
    print("KERNEL_OK")
</pallas_src>

<mosaic_0001>
module attributes {stable_mosaic.version = 11 : i64} {
  func.func @_policy_head_kernel(%arg0: i32, %arg1: memref<8x32x64xbf16, #tpu.memory_space<vmem>>, %arg2: memref<4x32xbf16, #tpu.memory_space<vmem>>, %arg3: memref<4x1x1xf32, #tpu.memory_space<vmem>>, %arg4: memref<4x64x256xbf16, #tpu.memory_space<vmem>>, %arg5: memref<1x256xf32, #tpu.memory_space<vmem>>, %arg6: memref<8x256xf32, #tpu.memory_space<vmem>>) attributes {dimension_semantics = [#tpu.dimension_semantics<parallel>], iteration_bounds = array<i64: 2>, scalar_prefetch = 0 : i64, scratch_operands = 0 : i64, tpu.core_type = #tpu.core_type<tc>, window_params = [{transform_indices = @transform_0, window_bounds = array<i64: 8, 32, 64>}, {pipeline_mode = #tpu.pipeline_mode<synchronous>, transform_indices = @transform_1, window_bounds = array<i64: 4, 32>}, {pipeline_mode = #tpu.pipeline_mode<synchronous>, transform_indices = @transform_2, window_bounds = array<i64: 4, 1, 1>}, {pipeline_mode = #tpu.pipeline_mode<synchronous>, transform_indices = @transform_3, window_bounds = array<i64: 4, 64, 256>}, {pipeline_mode = #tpu.pipeline_mode<synchronous>, transform_indices = @transform_4, window_bounds = array<i64: 1, 256>}, {transform_indices = @transform_5, window_bounds = array<i64: 8, 256>}]} {
    %c0 = arith.constant 0 : index
    %c0_0 = arith.constant 0 : index
    %c0_1 = arith.constant 0 : index
    %0 = vector.load %arg1[%c0, %c0_0, %c0_1] : memref<8x32x64xbf16, #tpu.memory_space<vmem>>, vector<8x32x64xbf16>
    %c0_2 = arith.constant 0 : index
    %c0_3 = arith.constant 0 : index
    %1 = vector.load %arg2[%c0_2, %c0_3] : memref<4x32xbf16, #tpu.memory_space<vmem>>, vector<4x32xbf16>
    "tpu.trace_start"() <{level = 10 : i32, message = "pc,nch->pnh"}> : () -> ()
    %cst = arith.constant dense<0.000000e+00> : vector<4x8x64xf32>
    %2 = tpu.matmul %1, %0, %cst {dimension_numbers = #tpu.dot_dimension_numbers<[1], [1], [0], [0, 2], [0, 0, 1, 0, 1, 2], [], []>} : vector<4x32xbf16>, vector<8x32x64xbf16>, vector<4x8x64xf32> -> vector<4x8x64xf32>
    "tpu.trace_stop"() : () -> ()
    %c0_4 = arith.constant 0 : index
    %c0_5 = arith.constant 0 : index
    %c0_6 = arith.constant 0 : index
    %3 = vector.load %arg3[%c0_4, %c0_5, %c0_6] : memref<4x1x1xf32, #tpu.memory_space<vmem>>, vector<4x1x1xf32>
    %4 = vector.broadcast %3 : vector<4x1x1xf32> to vector<4x8x64xf32>
    %5 = arith.addf %2, %4 : vector<4x8x64xf32>
    %cst_7 = arith.constant 0.000000e+00 : f32
    %6 = vector.broadcast %cst_7 : f32 to vector<4x8x64xf32>
    %7 = arith.maximumf %5, %6 : vector<4x8x64xf32>
    %8 = arith.truncf %7 : vector<4x8x64xf32> to vector<4x8x64xbf16>
    %9 = vector.extract_strided_slice %8 {offsets = [0, 0, 0], sizes = [1, 8, 64], strides = [1, 1, 1]} : vector<4x8x64xbf16> to vector<1x8x64xbf16>
    %10 = vector.shape_cast %9 : vector<1x8x64xbf16> to vector<8x64xbf16>
    %c0_8 = arith.constant 0 : index
    %c0_9 = arith.constant 0 : index
    %c0_10 = arith.constant 0 : index
    %11 = vector.load %arg4[%c0_8, %c0_9, %c0_10] : memref<4x64x256xbf16, #tpu.memory_space<vmem>>, vector<1x64x256xbf16>
    %12 = vector.shape_cast %11 : vector<1x64x256xbf16> to vector<64x256xbf16>
    %cst_11 = arith.constant dense<0.000000e+00> : vector<8x256xf32>
    %13 = tpu.matmul %10, %12, %cst_11 {dimension_numbers = #tpu.dot_dimension_numbers<[1], [0], [0], [1], [0, 0, 1, 1], [], []>} : vector<8x64xbf16>, vector<64x256xbf16>, vector<8x256xf32> -> vector<8x256xf32>
    %14 = vector.extract_strided_slice %8 {offsets = [1, 0, 0], sizes = [1, 8, 64], strides = [1, 1, 1]} : vector<4x8x64xbf16> to vector<1x8x64xbf16>
    %15 = vector.shape_cast %14 : vector<1x8x64xbf16> to vector<8x64xbf16>
    %c1 = arith.constant 1 : index
    %c0_12 = arith.constant 0 : index
    %c0_13 = arith.constant 0 : index
    %16 = vector.load %arg4[%c1, %c0_12, %c0_13] : memref<4x64x256xbf16, #tpu.memory_space<vmem>>, vector<1x64x256xbf16>
    %17 = vector.shape_cast %16 : vector<1x64x256xbf16> to vector<64x256xbf16>
    %cst_14 = arith.constant dense<0.000000e+00> : vector<8x256xf32>
    %18 = tpu.matmul %15, %17, %cst_14 {dimension_numbers = #tpu.dot_dimension_numbers<[1], [0], [0], [1], [0, 0, 1, 1], [], []>} : vector<8x64xbf16>, vector<64x256xbf16>, vector<8x256xf32> -> vector<8x256xf32>
    %19 = arith.addf %13, %18 : vector<8x256xf32>
    %20 = vector.extract_strided_slice %8 {offsets = [2, 0, 0], sizes = [1, 8, 64], strides = [1, 1, 1]} : vector<4x8x64xbf16> to vector<1x8x64xbf16>
    %21 = vector.shape_cast %20 : vector<1x8x64xbf16> to vector<8x64xbf16>
    %c2 = arith.constant 2 : index
    %c0_15 = arith.constant 0 : index
    %c0_16 = arith.constant 0 : index
    %22 = vector.load %arg4[%c2, %c0_15, %c0_16] : memref<4x64x256xbf16, #tpu.memory_space<vmem>>, vector<1x64x256xbf16>
    %23 = vector.shape_cast %22 : vector<1x64x256xbf16> to vector<64x256xbf16>
    %cst_17 = arith.constant dense<0.000000e+00> : vector<8x256xf32>
    %24 = tpu.matmul %21, %23, %cst_17 {dimension_numbers = #tpu.dot_dimension_numbers<[1], [0], [0], [1], [0, 0, 1, 1], [], []>} : vector<8x64xbf16>, vector<64x256xbf16>, vector<8x256xf32> -> vector<8x256xf32>
    %25 = arith.addf %19, %24 : vector<8x256xf32>
    %26 = vector.extract_strided_slice %8 {offsets = [3, 0, 0], sizes = [1, 8, 64], strides = [1, 1, 1]} : vector<4x8x64xbf16> to vector<1x8x64xbf16>
    %27 = vector.shape_cast %26 : vector<1x8x64xbf16> to vector<8x64xbf16>
    %c3 = arith.constant 3 : index
    %c0_18 = arith.constant 0 : index
    %c0_19 = arith.constant 0 : index
    %28 = vector.load %arg4[%c3, %c0_18, %c0_19] : memref<4x64x256xbf16, #tpu.memory_space<vmem>>, vector<1x64x256xbf16>
    %29 = vector.shape_cast %28 : vector<1x64x256xbf16> to vector<64x256xbf16>
    %cst_20 = arith.constant dense<0.000000e+00> : vector<8x256xf32>
    %30 = tpu.matmul %27, %29, %cst_20 {dimension_numbers = #tpu.dot_dimension_numbers<[1], [0], [0], [1], [0, 0, 1, 1], [], []>} : vector<8x64xbf16>, vector<64x256xbf16>, vector<8x256xf32> -> vector<8x256xf32>
    %31 = arith.addf %25, %30 : vector<8x256xf32>
    %c0_21 = arith.constant 0 : index
    %c0_22 = arith.constant 0 : index
    %32 = vector.load %arg5[%c0_21, %c0_22] : memref<1x256xf32, #tpu.memory_space<vmem>>, vector<1x256xf32>
    %33 = vector.broadcast %32 : vector<1x256xf32> to vector<8x256xf32>
    %34 = arith.addf %31, %33 : vector<8x256xf32>
    %c0_23 = arith.constant 0 : index
    %c0_24 = arith.constant 0 : index
    %35 = vector.load %arg6[%c0_23, %c0_24] : memref<8x256xf32, #tpu.memory_space<vmem>>, vector<8x256xf32>
    tpu.vector_store %arg6[%c0_23, %c0_24], %34 {strides = array<i32>} : memref<8x256xf32, #tpu.memory_space<vmem>>, vector<8x256xf32>,
    return
  }
  func.func @transform_0(%arg0: i32) -> (i32, i32, i32) {
    %c0_i32 = arith.constant 0 : i32
    %c0_i32_0 = arith.constant 0 : i32
    %c0_i32_1 = arith.constant 0 : i32
    return %arg0, %c0_i32, %c0_i32_0 : i32, i32, i32
  }
  func.func @transform_1(%arg0: i32) -> (i32, i32) {
    %c0_i32 = arith.constant 0 : i32
    %c0_i32_0 = arith.constant 0 : i32
    %c0_i32_1 = arith.constant 0 : i32
    return %c0_i32, %c0_i32_0 : i32, i32
  }
  func.func @transform_2(%arg0: i32) -> (i32, i32, i32) {
    %c0_i32 = arith.constant 0 : i32
    %c0_i32_0 = arith.constant 0 : i32
    %c0_i32_1 = arith.constant 0 : i32
    %c0_i32_2 = arith.constant 0 : i32
    return %c0_i32, %c0_i32_0, %c0_i32_1 : i32, i32, i32
  }
  func.func @transform_3(%arg0: i32) -> (i32, i32, i32) {
    %c0_i32 = arith.constant 0 : i32
    %c0_i32_0 = arith.constant 0 : i32
    %c0_i32_1 = arith.constant 0 : i32
    %c0_i32_2 = arith.constant 0 : i32
    return %c0_i32, %c0_i32_0, %c0_i32_1 : i32, i32, i32
  }
  func.func @transform_4(%arg0: i32) -> (i32, i32) {
    %c0_i32 = arith.constant 0 : i32
    %c0_i32_0 = arith.constant 0 : i32
    %c0_i32_1 = arith.constant 0 : i32
    return %c0_i32, %c0_i32_0 : i32, i32
  }
  func.func @transform_5(%arg0: i32) -> (i32, i32) {
    %c0_i32 = arith.constant 0 : i32
    %c0_i32_0 = arith.constant 0 : i32
    return %arg0, %c0_i32 : i32, i32
  }
}

</mosaic_0001>

<bundles_post_ra>
// kernel: policy_head_forward.1
= control target key start
LH: loop header
LB: loop body
LE: loop exit
PB: predicated region body
PF: predicated region fallthrough
CT: control target
= control target key end

     0   :  { %10 = vsyncpa [#allocation3], 0  ;;  %s2697_s0 = inlined_call_operand.vmem [shape: bf16[16,32,64], index: 0, kind: input, shape index: {}]   ;;  %s2698_s1 = inlined_call_operand.vmem [shape: bf16[4,32], index: 1, kind: input, shape index: {}]   ;;  %s2699_s2 = inlined_call_operand.vmem [shape: f32[4,1,1], index: 2, kind: input, shape index: {}]   ;;  %s2700_s3 = inlined_call_operand.vmem [shape: bf16[4,64,256], index: 3, kind: input, shape index: {}]   ;;  %s2701_s4 = inlined_call_operand.vmem [shape: f32[1,256], index: 4, kind: input, shape index: {}]   ;;  %s2702_s5 = inlined_call_operand.hbm [shape: f32[16,256], index: 5, kind: output, shape index: {}]  }
   0x1   :  { %12 = vsyncpa [#allocation3 + $0x1], 0  ;;  %s2187_s18 = smov 0   ;;  %s2189_s19 = smov 0  }
   0x2   :  { %s2191_s20 = smov 0   ;;  %s2193_s21 = smov 0  }
   0x3 LB: > { %s2208_s22 = sadd.s32 4294967295, %s2149_s21   ;;  %s1898_s23 = sadd.s32 4294967294, %s2149_s21   ;;  %s2149_s21 = sphi %s2193_s21, %s2708_s21   ;;  %s2145_s20 = sphi %s2191_s20, %s2707_s20   ;;  %s2141_s19 = sphi %s2189_s19, %s2706_s19   ;;  %s2137_s18 = sphi %s2187_s18, %s2705_s18  }
   0x4   : > { %s2212_s24 = sadd.s32 1, %s2149_s21   ;;  %s135_s25 = sadd.s32 1, %s2145_s20 }
   0x5   : > { %s132_s26 = ssub.s32 %s2149_s21, %s2212_s24  ;;  %p145_p0 = scmp.ne.s32.totalorder %s2145_s20, %s2141_s19 }
   0x6   : > { %p133_p1 = scmp.eq.s32.totalorder %s132_s26, 0  ;;  %p146_p2 = scmp.eq.s32.totalorder %s2208_s22, 1 }
   0x7   : > { %p151_p3 = scmp.ne.s32.totalorder %s2141_s19, %s2137_s18  ;;  %p152_p4 = scmp.eq.s32.totalorder %s1898_s23, 1 }
   0x8   : > { %s2223_s27 = scalar_select %p133_p1, %s2145_s20, %s135_s25  }
   0x9   : > { %p2225_p5 = por %p146_p2, %p145_p0  ;;  %p2229_p6 = por %p152_p4, %p151_p3 }
   0xa   : > { %p1901_p7 = scmp.ge.s32.totalorder %s2149_s21, 1  ;;  %p192_p8 = scmp.lt.s32.totalorder %s2149_s21, 3 }
   0xc   : > { %p193_p9 = pnand %p1901_p7, %p192_p8 }
   0xd   : > { %s1903_s30 = sshll.u32 (!%p193_p9), %s2208_s22, 3  ;;  %s2154_s10 = smov (!%p193_p9), 64  }
   0xe   : > { %196 = sbr.rel (%p193_p9) target bundleno = 783 (0x30f), region = 40  ;;  %p222_p10 = scmp.lt.s32.totalorder (!%p193_p9), %s1903_s30, 15 }
   0xf   : > { %s218_s7 = sand.u32 (!%p193_p9), 1, %s2141_s19  }
  0x10   : > { %s1902_s8 = sshll.u32 (!%p193_p9), %s218_s7, 4  ;;  %s1825_s17 = scalar_lea.sflag (!%p193_p9), [#allocation3], %s218_s7 }
  0x11   : > { %s220_s12 = scalar_lea.vmem (!%p193_p9), [#allocation2], %s1902_s8 }
  0x12   : > { %s1839_s13 = sshll.u32 (!%p193_p9), %s220_s12, 4  ;;  %s1840_s13 = int_to_ptr.vmem [resolvable:$true] %s1839_s13 }
  0x13   : > { %v306_v0 = vlaneseq  ;;  %v2151_v1 = vmov 1983009808   ;;  %v2152_v3 = vmov 0   ;;  %s2710_s30 = smov (!%p222_p10, %s1903_s30), 15  ;;  %v2153_v6 = vmov 1934713408  }
  0x14   : > { %v304_v2 = vunpack.c.l.s4 %v2151_v1  ;;  %2040 = vset.pattern.permute.xlu1 %v2152_v3  ;;  %2039 = vset.pattern.permute.xlu0 %v2152_v3  ;;  %s1993_s6 = sshll.u32 %s2710_s30, 4  ;;  %v321_v7 = vunpack.c.l.s4 %v2153_v6  ;;  %vm1134_vm0 = vcmask 523264   ;;  %vm1255_vm1 = vcmask 261120   ;;  %s2089_s23 = scalar_lea.vmem %s1840_s13, 256 }
  0x15   : > { %1332 = vmatprep.mubr.bf16.mxu1 %v2152_v3  ;;  %1291 = vmatprep.mubr.bf16.mxu0 %v2152_v3  ;;  %v2240_v5 = vshrl.u32 %v306_v0, 7  ;;  %s2245_s9 = scalar_lea.vmem %s2697_s0, %s1993_s6  ;;  %p2090_p11 = scmp.ne.s32.totalorder %s1840_s13, %s2089_s23 }
  0x16   : > { %v305_v4 = vunpack.c.0.s8 %v304_v2  ;;  %v231_v8 = vld [vmem:[%s2245_s9 + $0x8] sm:$0xf]  ;;  %v232_v9 = vld [vmem:[%s2245_s9 + $0xc] sm:$0xf]  ;;  %v235_v10 = vld [vmem:[%s2245_s9 + $0x18] sm:$0xf]  ;;  %v322_v21 = vunpack.c.0.s8 %v321_v7 }
  0x17   : > { %v236_v11 = vld [vmem:[%s2245_s9 + $0x1c] sm:$0xf]  ;;  %v239_v12 = vld [vmem:[%s2245_s9 + $0x28] sm:$0xf]  ;;  %v240_v13 = vld [vmem:[%s2245_s9 + $0x2c] sm:$0xf]  ;;  %p2091_p12 = pnand %p2090_p11, %p2225_p5 }
  0x18   : > { %v2254_v14 = vsub.s32 %v305_v4, %v2240_v5  ;;  %v243_v15 = vld [vmem:[%s2245_s9 + $0x38] sm:$0xf]  ;;  %v244_v16 = vld [vmem:[%s2245_s9 + $0x3c] sm:$0xf]  ;;  %v247_v17 = vld [vmem:[%s2245_s9 + $0x48] sm:$0xf]  ;;  %v2271_v38 = vsub.s32 %v322_v21, %v2240_v5 }
  0x19   : > { %v248_v18 = vld [vmem:[%s2245_s9 + $0x4c] sm:$0xf]  ;;  %v251_v19 = vld [vmem:[%s2245_s9 + $0x58] sm:$0xf]  ;;  %v252_v20 = vld [vmem:[%s2245_s9 + $0x5c] sm:$0xf]  ;;  %v438_v22 = vcombine.low %v231_v8, %v247_v17  ;;  %p2092_p13 = pneg %p2091_p12 }
  0x1a   : > { %v255_v23 = vld [vmem:[%s2245_s9 + $0x68] sm:$0xf]  ;;  %v256_v24 = vld [vmem:[%s2245_s9 + $0x6c] sm:$0xf]  ;;  %v259_v25 = vld [vmem:[%s2245_s9 + $0x78] sm:$0xf]  ;;  %v472_v26 = vcombine.low %v235_v10, %v251_v19  ;;  %v506_v27 = vcombine.low %v232_v9, %v248_v18  ;;  %v540_v28 = vcombine.low %v236_v11, %v252_v20 }
  0x1b   : > { %v260_v29 = vld [vmem:[%s2245_s9 + $0x7c] sm:$0xf]  ;;  %v445_v30 = vrot.slane %v438_v22, %v2254_v14  ;;  %v446_v31 = vcombine.low %v239_v12, %v255_v23  ;;  %v480_v32 = vcombine.low %v243_v15, %v259_v25  ;;  %v514_v33 = vcombine.low %v240_v13, %v256_v24 }
  0x1c   : > { %v479_v34 = vrot.slane %v472_v26, %v2254_v14  ;;  %v513_v35 = vrot.slane %v506_v27, %v2254_v14  ;;  %v547_v36 = vrot.slane %v540_v28, %v2254_v14  ;;  %v548_v37 = vcombine.low %v244_v16, %v260_v29 }
  0x1d   : > { %v453_v39 = vrot.slane %v446_v31, %v2254_v14  ;;  %v487_v40 = vrot.slane %v480_v32, %v2254_v14  ;;  %v521_v41 = vrot.slane %v514_v33, %v2254_v14 }
  0x1e   : > { %v555_v42 = vrot.slane %v548_v37, %v2254_v14 }
  0x1f   : > { %v454_v43 = vcombine.low %v445_v30, %v453_v39  ;;  %v455_v44 = vcombine.high %v445_v30, %v453_v39  ;;  %v488_v45 = vcombine.low %v479_v34, %v487_v40  ;;  %v489_v46 = vcombine.high %v479_v34, %v487_v40 }
  0x20   : > { %v522_v47 = vcombine.low %v513_v35, %v521_v41  ;;  %v523_v48 = vcombine.high %v513_v35, %v521_v41  ;;  %v556_v49 = vcombine.low %v547_v36, %v555_v42  ;;  %v557_v50 = vcombine.high %v547_v36, %v555_v42 }
  0x21   : > { %v462_v51 = vrot.slane %v454_v43, %v2271_v38  ;;  %v469_v52 = vrot.slane %v455_v44, %v2271_v38  ;;  %v496_v53 = vrot.slane %v488_v45, %v2271_v38  ;;  %v503_v54 = vrot.slane %v489_v46, %v2271_v38 }
  0x22   : > { %v530_v55 = vrot.slane %v522_v47, %v2271_v38  ;;  %v537_v56 = vrot.slane %v523_v48, %v2271_v38  ;;  %v564_v57 = vrot.slane %v556_v49, %v2271_v38  ;;  %v571_v58 = vrot.slane %v557_v50, %v2271_v38  ;;  %v229_v47 = vld [vmem:[%s2245_s9] sm:$0xf] }
  0x23   : > { %v470_v59 = vcombine.high %v462_v51, %v2152_v3  ;;  %v471_v60 = vcombine.high %v469_v52, %v2152_v3  ;;  %v504_v61 = vcombine.high %v496_v53, %v2152_v3  ;;  %v505_v62 = vcombine.high %v503_v54, %v2152_v3  ;;  %v245_v48 = vld [vmem:[%s2245_s9 + $0x40] sm:$0xf] }
  0x24   : > { %v538_v63 = vcombine.high %v530_v55, %v2152_v3  ;;  %v539_v0 = vcombine.high %v537_v56, %v2152_v3  ;;  %v572_v1 = vcombine.high %v564_v57, %v2152_v3  ;;  %v573_v2 = vcombine.high %v571_v58, %v2152_v3 }
  0x25   : > { %v640_v4 = vpack.i.b16 %v496_v53, %v462_v51  ;;  %v642_v6 = vshrl.u32 %v462_v51, 16  ;;  %v643_v7 = vshrl.u32 %v496_v53, 16  ;;  %v648_v8 = vpack.i.b16 %v504_v61, %v470_v59 }
  0x26   : > { %v650_v9 = vshrl.u32 %v470_v59, 16  ;;  %v651_v10 = vshrl.u32 %v504_v61, 16  ;;  %v656_v11 = vpack.i.b16 %v503_v54, %v469_v52  ;;  %v658_v12 = vshrl.u32 %v469_v52, 16 }
  0x27   : > { %v644_v13 = vpack.i.b16 %v643_v7, %v642_v6  ;;  %v659_v15 = vshrl.u32 %v503_v54, 16  ;;  %v664_v16 = vpack.i.b16 %v505_v62, %v471_v60  ;;  %v666_v17 = vshrl.u32 %v471_v60, 16 }
  0x28   : > { %v652_v18 = vpack.i.b16 %v651_v10, %v650_v9  ;;  %v667_v19 = vshrl.u32 %v505_v62, 16  ;;  %v672_v20 = vpack.i.b16 %v564_v57, %v530_v55  ;;  %v674_v21 = vshrl.u32 %v530_v55, 16 }
  0x29   : > { %v660_v22 = vpack.i.b16 %v659_v15, %v658_v12  ;;  %v675_v23 = vshrl.u32 %v564_v57, 16  ;;  %v680_v24 = vpack.i.b16 %v572_v1, %v538_v63  ;;  %v682_v25 = vshrl.u32 %v538_v63, 16 }
  0x2a   : > { %v668_v26 = vpack.i.b16 %v667_v19, %v666_v17  ;;  %v683_v27 = vshrl.u32 %v572_v1, 16  ;;  %v688_v28 = vpack.i.b16 %v571_v58, %v537_v56  ;;  %v690_v29 = vshrl.u32 %v537_v56, 16 }
  0x2b   : > { %v676_v30 = vpack.i.b16 %v675_v23, %v674_v21  ;;  %v691_v31 = vshrl.u32 %v571_v58, 16  ;;  %v696_v32 = vpack.i.b16 %v573_v2, %v539_v0  ;;  %v698_v33 = vshrl.u32 %v539_v0, 16 }
  0x2c   : > { %v684_v34 = vpack.i.b16 %v683_v27, %v682_v25  ;;  %v699_v35 = vshrl.u32 %v573_v2, 16  ;;  %v838_v36 = vcombine.low %v640_v4, %v656_v11  ;;  %v846_v37 = vcombine.low %v648_v8, %v664_v16 }
  0x2d   : > { %v692_v39 = vpack.i.b16 %v691_v31, %v690_v29  ;;  %v872_v40 = vcombine.low %v644_v13, %v660_v22  ;;  %v880_v41 = vcombine.low %v652_v18, %v668_v26  ;;  %v906_v42 = vcombine.low %v672_v20, %v688_v28  ;;  %v233_v28 = vld [vmem:[%s2245_s9 + $0x10] sm:$0xf] }
  0x2e   : > { %v700_v43 = vpack.i.b16 %v699_v35, %v698_v33  ;;  %v845_v44 = vrot.slane %v838_v36, %v2254_v14  ;;  %v853_v45 = vrot.slane %v846_v37, %v2254_v14  ;;  %v914_v46 = vcombine.low %v680_v24, %v696_v32  ;;  %v237_v33 = vld [vmem:[%s2245_s9 + $0x20] sm:$0xf] }
  0x2f   : > { %v879_v49 = vrot.slane %v872_v40, %v2254_v14  ;;  %v887_v50 = vrot.slane %v880_v41, %v2254_v14  ;;  %v913_v51 = vrot.slane %v906_v42, %v2254_v14  ;;  %v940_v52 = vcombine.low %v676_v30, %v692_v39  ;;  %v230_v40 = vld [vmem:[%s2245_s9 + $0x4] sm:$0xf]  ;;  %v249_v42 = vld [vmem:[%s2245_s9 + $0x50] sm:$0xf] }
  0x30   : > { %v854_v53 = vcombine.low %v845_v44, %v853_v45  ;;  %v921_v54 = vrot.slane %v914_v46, %v2254_v14  ;;  %v948_v55 = vcombine.low %v684_v34, %v700_v43  ;;  %v855_v56 = vcombine.high %v845_v44, %v853_v45  ;;  %v253_v34 = vld [vmem:[%s2245_s9 + $0x60] sm:$0xf]  ;;  %v238_v41 = vld [vmem:[%s2245_s9 + $0x24] sm:$0xf] }
  0x31   : > { %v888_v57 = vcombine.low %v879_v49, %v887_v50  ;;  %v947_v58 = vrot.slane %v940_v52, %v2254_v14  ;;  %v889_v59 = vcombine.high %v879_v49, %v887_v50  ;;  %v302_v60 = vcombine.low %v229_v47, %v245_v48  ;;  %v241_v47 = vld [vmem:[%s2245_s9 + $0x30] sm:$0xf]  ;;  %v246_v52 = vld [vmem:[%s2245_s9 + $0x44] sm:$0xf] }
  0x32   : > { %v2303_v61 = vrot.slane %v854_v53, %v2271_v38  ;;  %v922_v62 = vcombine.low %v913_v51, %v921_v54  ;;  %v955_v63 = vrot.slane %v948_v55, %v2254_v14  ;;  %v2307_v0 = vrot.slane %v855_v56, %v2271_v38  ;;  %v257_v48 = vld [vmem:[%s2245_s9 + $0x70] sm:$0xf]  ;;  %v254_v53 = vld [vmem:[%s2245_s9 + $0x64] sm:$0xf] }
  0x33   : > { %v2310_v1 = vrot.slane %v888_v57, %v2271_v38  ;;  %v2313_v2 = vrot.slane %v889_v59, %v2271_v38  ;;  %v923_v4 = vcombine.high %v913_v51, %v921_v54  ;;  %v2316_v6 = vrot.slane %v302_v60, %v2254_v14  ;;  %v250_v59 = vld [vmem:[%s2245_s9 + $0x54] sm:$0xf] }
  0x34   : > { %v2319_v7 = vrot.slane %v922_v62, %v2271_v38  ;;  %v956_v8 = vcombine.low %v947_v58, %v955_v63  ;;  %v1025_v9 = vshrl.u32 %v2303_v61, 16  ;;  %v2324_v10 = vcombine.high %v2303_v61, %v2152_v3 }
  0x35   : > { %v1026_v11 = vshrl.u32 %v2310_v1, 16  ;;  %v2329_v12 = vcombine.high %v2310_v1, %v2152_v3  ;;  %v2332_v13 = vrot.slane %v923_v4, %v2271_v38  ;;  %v957_v15 = vcombine.high %v947_v58, %v955_v63  ;;  %v234_v58 = vld [vmem:[%s2245_s9 + $0x14] sm:$0xf] }
  0x36   : > { %v2335_v16 = vrot.slane %v956_v8, %v2271_v38  ;;  %v1049_v17 = vshrl.u32 %v2319_v7, 16  ;;  %v2340_v18 = vcombine.high %v2319_v7, %v2152_v3  ;;  %v1031_v19 = vshrl.u32 %v2324_v10, 16  ;;  %v242_v4 = vld [vmem:[%s2245_s9 + $0x34] sm:$0xf] }
  0x37   : > { %v1027_v20 = vpack.i.b16 %v1026_v11, %v1025_v9  ;;  %v1032_v21 = vshrl.u32 %v2329_v12, 16  ;;  %v2345_v22 = vrot.slane %v957_v15, %v2271_v38  ;;  %v1037_v23 = vshrl.u32 %v2307_v0, 16  ;;  %v258_v8 = vld [vmem:[%s2245_s9 + $0x74] sm:$0xf] }
  0x38   : > { %v1050_v24 = vshrl.u32 %v2335_v16, 16  ;;  %v2351_v25 = vcombine.high %v2335_v16, %v2152_v3  ;;  %v1055_v26 = vshrl.u32 %v2340_v18, 16  ;;  %v1038_v27 = vshrl.u32 %v2313_v2, 16 }
  0x39   : > { %v1033_v29 = vpack.i.b16 %v1032_v21, %v1031_v19  ;;  %v1061_v30 = vshrl.u32 %v2332_v13, 16  ;;  %v1062_v31 = vshrl.u32 %v2345_v22, 16  ;;  %v2360_v32 = vcombine.high %v2307_v0, %v2152_v3 }
  0x3a   : > { %v1051_v35 = vpack.i.b16 %v1050_v24, %v1049_v17  ;;  %v1056_v36 = vshrl.u32 %v2351_v25, 16  ;;  %v1039_v37 = vpack.i.b16 %v1038_v27, %v1037_v23  ;;  %v2367_v39 = vcombine.high %v2313_v2, %v2152_v3 }
  0x3b   : > { %v1063_v43 = vpack.i.b16 %v1062_v31, %v1061_v30  ;;  %v2374_v44 = vcombine.high %v2332_v13, %v2152_v3  ;;  %v2378_v45 = vcombine.high %v2345_v22, %v2152_v3  ;;  %v1043_v46 = vshrl.u32 %v2360_v32, 16 }
  0x3c   : > { %v1913_v49 = vcombine.low %v1027_v20, %v1051_v35  ;;  %v1057_v50 = vpack.i.b16 %v1056_v36, %v1055_v26  ;;  %v1044_v51 = vshrl.u32 %v2367_v39, 16  ;;  %v310_v54 = vcombine.low %v237_v33, %v253_v34 }
  0x3d   : > { %v1921_v55 = vcombine.low %v1039_v37, %v1063_v43  ;;  %v1067_v56 = vshrl.u32 %v2374_v44, 16  ;;  %v1068_v57 = vshrl.u32 %v2378_v45, 16  ;;  %v336_v60 = vcombine.low %v233_v28, %v249_v42 }
  0x3e   : > { %1084 = vrot.lane.b32.xlu1 %v1913_v49, %s2154_s10  ;;  %v1917_v62 = vcombine.low %v1033_v29, %v1057_v50  ;;  %v1045_v63 = vpack.i.b16 %v1044_v51, %v1043_v46  ;;  %v317_v9 = vrot.slane %v310_v54, %v2254_v14  ;;  %v344_v11 = vcombine.low %v241_v47, %v257_v48 }
  0x3f   : > { %v1069_v15 = vpack.i.b16 %v1068_v57, %v1067_v56  ;;  %v343_v17 = vrot.slane %v336_v60, %v2254_v14  ;;  %v370_v19 = vcombine.low %v230_v40, %v246_v52  ;;  %v378_v20 = vcombine.low %v238_v41, %v254_v53 }
  0x40   : > { %1100 = vrot.lane.b32.xlu0 %v1917_v62, %s2154_s10  ;;  %v318_v21 = vcombine.low %v2316_v6, %v317_v9  ;;  %v319_v23 = vcombine.high %v2316_v6, %v317_v9  ;;  %v351_v24 = vrot.slane %v344_v11, %v2254_v14  ;;  %v404_v26 = vcombine.low %v234_v58, %v250_v59 }
  0x41   : > { %v1925_v27 = vcombine.low %v1045_v63, %v1069_v15  ;;  %v377_v28 = vrot.slane %v370_v19, %v2254_v14  ;;  %v385_v29 = vrot.slane %v378_v20, %v2254_v14  ;;  %v412_v30 = vcombine.low %v242_v4, %v258_v8 }
  0x42   : > { %1116 = vrot.lane.b32.xlu1 %v1921_v55, %s2154_s10  ;;  %v326_v31 = vrot.slane %v318_v21, %v2271_v38  ;;  %v333_v33 = vrot.slane %v319_v23, %v2271_v38  ;;  %v352_v34 = vcombine.low %v343_v17, %v351_v24  ;;  %v353_v35 = vcombine.high %v343_v17, %v351_v24 }
  0x43   : > { %v386_v36 = vcombine.low %v377_v28, %v385_v29  ;;  %v387_v37 = vcombine.high %v377_v28, %v385_v29  ;;  %v411_v6 = vrot.slane %v404_v26, %v2254_v14  ;;  %v419_v40 = vrot.slane %v412_v30, %v2254_v14 }
  0x44   : > { %1132 = vrot.lane.b32.xlu0 %v1925_v27, %s2154_s10  ;;  %v334_v41 = vcombine.high %v326_v31, %v2152_v3  ;;  %v335_v42 = vcombine.high %v333_v33, %v2152_v3  ;;  %v360_v43 = vrot.slane %v352_v34, %v2271_v38  ;;  %v367_v46 = vrot.slane %v353_v35, %v2271_v38 }
  0x45   : > { %v394_v47 = vrot.slane %v386_v36, %v2271_v38  ;;  %v401_v48 = vrot.slane %v387_v37, %v2271_v38  ;;  %v420_v49 = vcombine.low %v411_v6, %v419_v40  ;;  %v421_v50 = vcombine.high %v411_v6, %v419_v40 }
  0x46   : > { %v368_v51 = vcombine.high %v360_v43, %v2152_v3  ;;  %v369_v52 = vcombine.high %v367_v46, %v2152_v3  ;;  %v576_v53 = vpack.i.b16 %v360_v43, %v326_v31  ;;  %v578_v54 = vshrl.u32 %v326_v31, 16 }
  0x47   : > { %v402_v55 = vcombine.high %v394_v47, %v2152_v3  ;;  %v403_v56 = vcombine.high %v401_v48, %v2152_v3  ;;  %v428_v57 = vrot.slane %v420_v49, %v2271_v38  ;;  %v435_v58 = vrot.slane %v421_v50, %v2271_v38 }
  0x48   : > { %v579_v59 = vshrl.u32 %v360_v43, 16  ;;  %v584_v60 = vpack.i.b16 %v368_v51, %v334_v41  ;;  %v586_v62 = vshrl.u32 %v334_v41, 16  ;;  %v587_v63 = vshrl.u32 %v368_v51, 16 }
  0x49   : > { %v436_v4 = vcombine.high %v428_v57, %v2152_v3  ;;  %v437_v8 = vcombine.high %v435_v58, %v2152_v3  ;;  %v592_v9 = vpack.i.b16 %v367_v46, %v333_v33  ;;  %v594_v11 = vshrl.u32 %v333_v33, 16 }
  0x4a   : > { %v580_v15 = vpack.i.b16 %v579_v59, %v578_v54  ;;  %v588_v17 = vpack.i.b16 %v587_v63, %v586_v62  ;;  %v595_v19 = vshrl.u32 %v367_v46, 16  ;;  %v600_v20 = vpack.i.b16 %v369_v52, %v335_v42 }
  0x4b   : > { %v602_v21 = vshrl.u32 %v335_v42, 16  ;;  %v603_v23 = vshrl.u32 %v369_v52, 16  ;;  %v608_v24 = vpack.i.b16 %v428_v57, %v394_v47  ;;  %v610_v26 = vshrl.u32 %v394_v47, 16 }
  0x4c   : > { %v596_v27 = vpack.i.b16 %v595_v19, %v594_v11  ;;  %v611_v28 = vshrl.u32 %v428_v57, 16  ;;  %v616_v29 = vpack.i.b16 %v436_v4, %v402_v55  ;;  %v618_v30 = vshrl.u32 %v402_v55, 16 }
  0x4d   : > { %v604_v31 = vpack.i.b16 %v603_v23, %v602_v21  ;;  %v619_v34 = vshrl.u32 %v436_v4, 16  ;;  %v624_v35 = vpack.i.b16 %v435_v58, %v401_v48  ;;  %v626_v36 = vshrl.u32 %v401_v48, 16 }
  0x4e   : > { %v612_v37 = vpack.i.b16 %v611_v28, %v610_v26  ;;  %v627_v6 = vshrl.u32 %v435_v58, 16  ;;  %v632_v40 = vpack.i.b16 %v437_v8, %v403_v56  ;;  %v634_v33 = vshrl.u32 %v403_v56, 16 }
  0x4f   : > { %v620_v41 = vpack.i.b16 %v619_v34, %v618_v30  ;;  %v635_v43 = vshrl.u32 %v437_v8, 16  ;;  %v702_v46 = vcombine.low %v576_v53, %v592_v9  ;;  %v710_v49 = vcombine.low %v584_v60, %v600_v20 }
  0x50   : > { %v628_v42 = vpack.i.b16 %v627_v6, %v626_v36  ;;  %v736_v50 = vcombine.low %v580_v15, %v596_v27  ;;  %v744_v51 = vcombine.low %v588_v17, %v604_v31  ;;  %v770_v47 = vcombine.low %v608_v24, %v624_v35 }
  0x51   : > { %v636_v52 = vpack.i.b16 %v635_v43, %v634_v33  ;;  %v709_v54 = vrot.slane %v702_v46, %v2254_v14  ;;  %v717_v55 = vrot.slane %v710_v49, %v2254_v14  ;;  %v778_v57 = vcombine.low %v616_v29, %v632_v40 }
  0x52   : > { %v743_v48 = vrot.slane %v736_v50, %v2254_v14  ;;  %v751_v58 = vrot.slane %v744_v51, %v2254_v14  ;;  %v777_v56 = vrot.slane %v770_v47, %v2254_v14  ;;  %v804_v59 = vcombine.low %v612_v37, %v628_v42 }
  0x53   : > { %v719_v62 = vcombine.high %v709_v54, %v717_v55  ;;  %v785_v53 = vrot.slane %v778_v57, %v2254_v14  ;;  %v812_v60 = vcombine.low %v620_v41, %v636_v52  ;;  %v718_v63 = vcombine.low %v709_v54, %v717_v55 }
  0x54   : > { %v753_v4 = vcombine.high %v743_v48, %v751_v58  ;;  %v811_v8 = vrot.slane %v804_v59, %v2254_v14  ;;  %v752_v9 = vcombine.low %v743_v48, %v751_v58  ;;  %v1030_v11 = vpack.i.b16 %v2329_v12, %v2324_v10 }
  0x55   : > { %v2431_v15 = vrot.slane %v719_v62, %v2271_v38  ;;  %v787_v17 = vcombine.high %v777_v56, %v785_v53  ;;  %v819_v19 = vrot.slane %v812_v60, %v2254_v14  ;;  %v2435_v20 = vrot.slane %v718_v63, %v2271_v38 }
  0x56   : > { %v2438_v21 = vrot.slane %v753_v4, %v2271_v38  ;;  %v2441_v23 = vrot.slane %v752_v9, %v2271_v38  ;;  %v786_v24 = vcombine.low %v777_v56, %v785_v53  ;;  %v1054_v26 = vpack.i.b16 %v2351_v25, %v2340_v18 }
  0x57   : > { %v2447_v10 = vcombine.high %v2431_v15, %v2152_v3  ;;  %v2450_v12 = vrot.slane %v787_v17, %v2271_v38  ;;  %v821_v27 = vcombine.high %v811_v8, %v819_v19  ;;  %v734_v28 = vcombine.high %v2435_v20, %v2152_v3 }
  0x58   : > { %v769_v29 = vcombine.high %v2438_v21, %v2152_v3  ;;  %v768_v30 = vcombine.high %v2441_v23, %v2152_v3  ;;  %v2459_v31 = vrot.slane %v786_v24, %v2271_v38  ;;  %v820_v18 = vcombine.low %v811_v8, %v819_v19 }
  0x59   : > { %v803_v25 = vcombine.high %v2450_v12, %v2152_v3  ;;  %v835_v34 = vrot.slane %v821_v27, %v2271_v38  ;;  %v995_v35 = vshrl.u32 %v2447_v10, 16  ;;  %v983_v36 = vshrl.u32 %v734_v28, 16 }
  0x5a   : > { %v996_v37 = vshrl.u32 %v769_v29, 16  ;;  %v802_v6 = vcombine.high %v2459_v31, %v2152_v3  ;;  %v828_v40 = vrot.slane %v820_v18, %v2271_v38  ;;  %v984_v33 = vshrl.u32 %v768_v30, 16 }
  0x5b   : > { %v837_v41 = vcombine.high %v835_v34, %v2152_v3  ;;  %v1019_v43 = vshrl.u32 %v803_v25, 16  ;;  %v989_v46 = vshrl.u32 %v2431_v15, 16  ;;  %v990_v49 = vshrl.u32 %v2438_v21, 16 }
  0x5c   : > { %v997_v42 = vpack.i.b16 %v996_v37, %v995_v35  ;;  %v836_v50 = vcombine.high %v828_v40, %v2152_v3  ;;  %v985_v51 = vpack.i.b16 %v984_v33, %v983_v36  ;;  %v1007_v47 = vshrl.u32 %v802_v6, 16 }
  0x5d   : > { %v1020_v52 = vshrl.u32 %v837_v41, 16  ;;  %v991_v54 = vpack.i.b16 %v990_v49, %v989_v46  ;;  %v1013_v55 = vshrl.u32 %v2450_v12, 16  ;;  %v1014_v57 = vshrl.u32 %v835_v34, 16 }
  0x5e   : > { %v1008_v48 = vshrl.u32 %v836_v50, 16  ;;  %v977_v58 = vshrl.u32 %v2435_v20, 16  ;;  %v978_v56 = vshrl.u32 %v2441_v23, 16  ;;  %v1001_v59 = vshrl.u32 %v2459_v31, 16 }
  0x5f   : > { %v1021_v62 = vpack.i.b16 %v1020_v52, %v1019_v43  ;;  %v1015_v53 = vpack.i.b16 %v1014_v57, %v1013_v55  ;;  %v1002_v60 = vshrl.u32 %v828_v40, 16  ;;  %v1915_v63 = vcombine.low %v1030_v11, %v1054_v26  ;;  %v261_v52 = vld [vmem:[%s2698_s1] sm:$0x3] }
  0x60   : > { %v1009_v4 = vpack.i.b16 %v1008_v48, %v1007_v47  ;;  %v979_v8 = vpack.i.b16 %v978_v56, %v977_v58  ;;  %v1024_v9 = vpack.i.b16 %v2310_v1, %v2303_v61  ;;  %v1048_v27 = vpack.i.b16 %v2335_v16, %v2319_v7 }
  0x61   : > { %v1924_v17 = vcombine.low %v997_v42, %v1021_v62  ;;  %v1920_v19 = vcombine.low %v991_v54, %v1015_v53  ;;  %v1003_v24 = vpack.i.b16 %v1002_v60, %v1001_v59  ;;  %v1042_v35 = vpack.i.b16 %v2367_v39, %v2360_v32 }
  0x62   : > { %v1916_v18 = vcombine.low %v985_v51, %v1009_v4  ;;  %v1066_v36 = vpack.i.b16 %v2378_v45, %v2374_v44  ;;  %v1036_v11 = vpack.i.b16 %v2313_v2, %v2307_v0  ;;  %v1911_v61 = vcombine.low %v1024_v9, %v1048_v27 }
  0x63   : > { %1130 = vrot.lane.b32.xlu1 %v1924_v17, %s2154_s10  ;;  %v1912_v26 = vcombine.low %v979_v8, %v1003_v24  ;;  %v1060_v1 = vpack.i.b16 %v2345_v22, %v2332_v13  ;;  %v982_v37 = vpack.i.b16 %v768_v30, %v734_v28  ;;  %v1006_v16 = vpack.i.b16 %v836_v50, %v802_v6 }
  0x64   : > { %1098 = vrot.lane.b32.xlu0 %v1916_v18, %s2154_s10  ;;  %v1923_v7 = vcombine.low %v1042_v35, %v1066_v36  ;;  %v994_v32 = vpack.i.b16 %v769_v29, %v2447_v10  ;;  %v1018_v39 = vpack.i.b16 %v837_v41, %v803_v25  ;;  %v988_v44 = vpack.i.b16 %v2438_v21, %v2431_v15  ;;  %v1907_v10 = vld [vmem:[%s2699_s2 + $0x1] ss:$0 sm:$0xff]  ;;  %v1906_v15 = vld [vmem:[%s2699_s2] ss:$0 sm:$0xff]  ;;  %v1909_v21 = vld [vmem:[%s2699_s2 + $0x3] ss:$0 sm:$0xff] }
  0x65   : > { %v1919_v33 = vcombine.low %v1036_v11, %v1060_v1  ;;  %v1012_v0 = vpack.i.b16 %v835_v34, %v2450_v12  ;;  %v976_v2 = vpack.i.b16 %v2441_v23, %v2435_v20  ;;  %v1914_v45 = vcombine.low %v982_v37, %v1006_v16  ;;  %v1908_v20 = vld [vmem:[%s2699_s2 + $0x2] ss:$0 sm:$0xff]  ;;  %v2043_v16 = vld [vmem:[%s2700_s3 + $0x74] ss:$8 sps:$4 sm:$0xff]  }
  0x66   : > { %v1922_v43 = vcombine.low %v994_v32, %v1018_v39  ;;  %v1000_v13 = vpack.i.b16 %v828_v40, %v2459_v31  ;;  %v2155_v36 = vmov 0.0   ;;  %v2046_v32 = vld [vmem:[%s2700_s3 + $0x34] ss:$8 sps:$4 sm:$0xff]   ;;  %v2041_v39 = vld [vmem:[%s2700_s3 + $0x70] ss:$8 sps:$4 sm:$0xff]  }
  0x67   : > { %1114 = vrot.lane.b32.xlu1 %v1920_v19, %s2154_s10  ;;  %v1918_v22 = vcombine.low %v988_v44, %v1012_v0  ;;  %v2049_v44 = vld [vmem:[%s2700_s3 + $0x64] ss:$8 sps:$4 sm:$0xff]  }
  0x68   : > { %1082 = vrot.lane.b32.xlu0 %v1912_v26, %s2154_s10  ;;  %v1910_v28 = vcombine.low %v976_v2, %v1000_v13  ;;  %v2052_v0 = vld [vmem:[%s2700_s3 + $0x24] ss:$8 sps:$4 sm:$0xff]   ;;  %v2047_v2 = vld [vmem:[%s2700_s3 + $0x60] ss:$8 sps:$4 sm:$0xff]  }
  0x6b   : > { %291 = vperm.xlu1 %2040, %v1907_v10  }
  0x6c   : > { %287 = vperm.xlu0 %2039, %v1906_v15   ;;  %v2055_v15 = vld [vmem:[%s2700_s3 + $0x54] ss:$8 sps:$4 sm:$0xff]  }
  0x6f   : > { %295 = vperm.xlu1 %2040, %v1908_v20   ;;  %v2058_v20 = vld [vmem:[%s2700_s3 + $0x14] ss:$8 sps:$4 sm:$0xff]  }
  0x70   : > { %299 = vperm.xlu0 %2039, %v1909_v21  }
  0xb0   : > { %v1085_v23 = vpop.permute.xlu1 %1084 }
  0xb1   : > { %v1141_v29 = vsel %vm1134_vm0, %v1911_v61, %v1085_v23 }
  0xb2   : > { %v1101_v12 = vpop.permute.xlu0 %1100 }
  0xb3   : > { %v1149_v30 = vsel %vm1134_vm0, %v1915_v63, %v1101_v12 }
  0xb4   : > { %1271 = vmatprep.subr.bf16.mxu0 %v1149_v30  ;;  %v1117_v31 = vpop.permute.xlu1 %1116  ;;  %v2053_v30 = vld [vmem:[%s2700_s3 + $0x50] ss:$8 sps:$4 sm:$0xff]  }
  0xb5   : > { %1272 = vmatpush1.bf16.msra.mxu0 %v1141_v29  ;;  %v1157_v34 = vsel %vm1134_vm0, %v1919_v33, %v1117_v31  ;;  %v2044_v33 = vld [vmem:[%s2700_s3 + $0x30] ss:$8 sps:$4 sm:$0xff]  }
  0xb6   : > { %v1133_v25 = vpop.permute.xlu0 %1132  ;;  %v2056_v31 = vld [vmem:[%s2700_s3 + $0x10] ss:$8 sps:$4 sm:$0xff]  }
  0xb7   : > { %v1165_v6 = vsel %vm1134_vm0, %v1923_v7, %v1133_v25 }
  0xb8   : > { %1312 = vmatprep.subr.bf16.mxu1 %v1165_v6 }
  0xb9   : > { %1313 = vmatpush1.bf16.msra.mxu1 %v1157_v34 }
  0xd5   : > { %v1131_v40 = vpop.permute.xlu1 %1130 }
  0xd6   : > { %v1099_v41 = vpop.permute.xlu0 %1098  ;;  %v1161_v46 = vsel %vm1134_vm0, %v1922_v43, %v1131_v40 }
  0xd7   : > { %v1145_v49 = vsel %vm1134_vm0, %v1914_v45, %v1099_v41  ;;  %1314 = vmatprep.subr.bf16.mxu1 %v1161_v46  ;;  %v2050_v45 = vld [vmem:[%s2700_s3 + $0x20] ss:$8 sps:$4 sm:$0xff]  }
  0xd8   : > { %1273 = vmatprep.subr.bf16.mxu0 %v1145_v49 }
  0xd9   : > { %v1115_v42 = vpop.permute.xlu1 %1114 }
  0xda   : > { %v1153_v50 = vsel %vm1134_vm0, %v1918_v22, %v1115_v42  ;;  %v1083_v51 = vpop.permute.xlu0 %1082 }
  0xdb   : > { %1315 = vmatpush1.bf16.msra.mxu1 %v1153_v50  ;;  %v1137_v47 = vsel %vm1134_vm0, %v1910_v28, %v1083_v51  ;;  %v2061_v50 = vld [vmem:[%s2700_s3 + $0x44] ss:$8 sps:$4 sm:$0xff]  }
  0xdc   : > { %1274 = vmatpush1.bf16.msra.mxu0 %v1137_v47  ;;  %1585 = vmatprep.subr.bf16.mxu1 %v2046_v32  ;;  %v2064_v51 = vld [vmem:[%s2700_s3 + $0x4] ss:$8 sps:$4 sm:$0xff]  }
  0xdd   : > { %1501 = vmatprep.subr.bf16.mxu0 %v2043_v16 }
  0xde   : > { %1927 = vmatmul.mubr.msk.bf16.vlgmr.msra.gmra.mxu1 %vm1255_vm1, %v261_v52 }
  0xdf   : > { %1926 = vmatmul.mubr.msk.bf16.vlgmr.msra.gmra.mxu0 %vm1255_vm1, %v261_v52  ;;  %1609 = vmatprep.mubr.bf16.mxu1 %v2152_v3 }
  0xe0   : > { %1525 = vmatprep.mubr.bf16.mxu0 %v2152_v3  ;;  %1502 = vmatpush1.bf16.msra.mxu0 %v2041_v39  ;;  %v2068_v39 = vld [vmem:[%s2700_s3 + $0xf0] ss:$8 sps:$4 sm:$0xff]  }
  0xe1   : > { %1586 = vmatpush1.bf16.msra.mxu1 %v2044_v33  ;;  %1503 = vmatprep.subr.bf16.mxu0 %v2049_v44 }
  0xe2   : > { %1587 = vmatprep.subr.bf16.mxu1 %v2052_v0  ;;  %v2076_v0 = vld [vmem:[%s2700_s3 + $0xe4] ss:$8 sps:$4 sm:$0xff]  }
  0xe4   : > { %1504 = vmatpush1.bf16.msra.mxu0 %v2047_v2  ;;  %v2071_v2 = vld [vmem:[%s2700_s3 + $0xa0] ss:$8 sps:$4 sm:$0xff]  }
  0xe5   : > { %1588 = vmatpush1.bf16.msra.mxu1 %v2050_v45  ;;  %1505 = vmatprep.subr.bf16.mxu0 %v2055_v15  ;;  %v2074_v45 = vld [vmem:[%s2700_s3 + $0xe0] ss:$8 sps:$4 sm:$0xff]  }
  0xe6   : > { %v292_v54 = vpop.permute.xlu1 %291  ;;  %1589 = vmatprep.subr.bf16.mxu1 %v2058_v20  ;;  %v2083_v15 = vld [vmem:[%s2700_s3 + $0x80] ss:$8 sps:$4 sm:$0xff]  }
  0xe7   : > { %v288_v55 = vpop.permute.xlu0 %287  ;;  %v2086_v20 = vld [vmem:[%s2700_s3 + $0xc0] ss:$8 sps:$4 sm:$0xff]  }
  0xe8   : > { %1506 = vmatpush1.bf16.msra.mxu0 %v2053_v30 }
  0xe9   : > { %1590 = vmatpush1.bf16.msra.mxu1 %v2056_v31  ;;  %1507 = vmatprep.subr.bf16.mxu0 %v2061_v50 }
  0xea   : > { %v296_v57 = vpop.permute.xlu1 %295  ;;  %1591 = vmatprep.subr.bf16.mxu1 %v2064_v51  ;;  %v1816_v51 = vsub.s32 1, %v2240_v5 }
  0xeb   : > { %v1167_v48 = vcombine.low %v288_v55, %v296_v57  ;;  %v1168_v58 = vcombine.high %v288_v55, %v296_v57  ;;  %v300_v56 = vpop.permute.xlu0 %299  ;;  %v2062_v55 = vld [vmem:[%s2700_s3] ss:$8 sps:$4 sm:$0xff]  }
  0xec   : > { %v1183_v59 = vcombine.low %v292_v54, %v300_v56  ;;  %v1184_v62 = vcombine.high %v292_v54, %v300_v56  ;;  %v2059_v54 = vld [vmem:[%s2700_s3 + $0x40] ss:$8 sps:$4 sm:$0xff]  }
  0xed   : > { %v1175_v53 = vrot.slane %v1167_v48, %v2254_v14  ;;  %v1182_v60 = vrot.slane %v1168_v58, %v2254_v14  ;;  %1508 = vmatpush1.bf16.msra.mxu0 %v2059_v54  ;;  %1592 = vmatpush1.bf16.msra.mxu1 %v2062_v55  ;;  %v2067_v48 = vld [vmem:[%s2700_s3 + $0xb4] ss:$8 sps:$4 sm:$0xff]  }
  0xee   : > { %v1191_v63 = vrot.slane %v1183_v59, %v2254_v14  ;;  %v1198_v4 = vrot.slane %v1184_v62, %v2254_v14  ;;  %v2070_v58 = vld [vmem:[%s2700_s3 + $0xf4] ss:$8 sps:$4 sm:$0xff]   ;;  %1678 = vmatprep.subr.bf16.mxu0 %v2067_v48 }
  0xef   : > { %1773 = vmatprep.subr.bf16.mxu1 %v2070_v58 }
  0xf0   : > { %v1199_v8 = vcombine.low %v1175_v53, %v1191_v63  ;;  %v1200_v9 = vcombine.high %v1175_v53, %v1191_v63  ;;  %v1215_v17 = vcombine.low %v1182_v60, %v1198_v4  ;;  %v1216_v19 = vcombine.high %v1182_v60, %v1198_v4 }
  0xf2   : > { %v1214_v24 = vrot.slane %v1200_v9, %v2271_v38  ;;  %v1207_v27 = vrot.slane %v1199_v8, %v2271_v38  ;;  %v1230_v18 = vrot.slane %v1216_v19, %v2271_v38  ;;  %v1223_v35 = vrot.slane %v1215_v17, %v2271_v38 }
  0xf4   : > { %v1232_v11 = vcombine.high %v1214_v24, %v2155_v36  ;;  %v1231_v26 = vcombine.high %v1207_v27, %v2155_v36  ;;  %v1234_v61 = vcombine.high %v1230_v18, %v2155_v36  ;;  %v1233_v1 = vcombine.high %v1223_v35, %v2155_v36 }
  0xf6   : > { %1240 = vrot.lane.b32.xlu0 %v1232_v11, %s2154_s10  ;;  %1236 = vrot.lane.b32.xlu1 %v1231_v26, %s2154_s10 }
  0xfa   : > { %1248 = vrot.lane.b32.xlu0 %v1234_v61, %s2154_s10  ;;  %1244 = vrot.lane.b32.xlu1 %v1233_v1, %s2154_s10 }
 0x168   : > { %v1241_v37 = vpop.permute.xlu0 %1240  ;;  %v1237_v7 = vpop.permute.xlu1 %1236 }
 0x169   : > { %v1251_v10 = vsel %vm1134_vm0, %v1207_v27, %v1237_v7  ;;  %v1252_v6 = vsel %vm1134_vm0, %v1214_v24, %v1241_v37 }
 0x16c   : > { %v1249_v43 = vpop.permute.xlu0 %1248  ;;  %v1245_v13 = vpop.permute.xlu1 %1244 }
 0x16d   : > { %v1253_v21 = vsel %vm1134_vm0, %v1223_v35, %v1245_v13  ;;  %v1254_v12 = vsel %vm1134_vm0, %v1230_v18, %v1249_v43  ;;  %v2079_v43 = vld [vmem:[%s2700_s3 + $0x94] ss:$8 sps:$4 sm:$0xff]  }
 0x16e   : > { %v2082_v13 = vld [vmem:[%s2700_s3 + $0xd4] ss:$8 sps:$4 sm:$0xff]  }
 0x19e   : > { %v1334_v22 = vpop.f32.mrf.mxu1 }
 0x19f   : > { %v1293_v28 = vpop.f32.mrf.mxu0  ;;  %v1335_v25 = vadd.f32 %v1334_v22, %v1253_v21  ;;  %v2077_v22 = vld [vmem:[%s2700_s3 + $0x90] ss:$8 sps:$4 sm:$0xff]  }
 0x1a0   : > { %v1294_v23 = vadd.f32 %v1293_v28, %v1251_v10  ;;  %v1336_v29 = vpop.f32.mrf.mxu1  ;;  %v2080_v10 = vld [vmem:[%s2700_s3 + $0xd0] ss:$8 sps:$4 sm:$0xff]   ;;  %v2085_v28 = vld [vmem:[%s2700_s3 + $0x84] ss:$8 sps:$4 sm:$0xff]  }
 0x1a1   : > { %v1337_v34 = vadd.f32 %v1336_v29, %v1254_v12  ;;  %v1295_v40 = vpop.f32.mrf.mxu0 }
 0x1a2   : > { %v1296_v41 = vadd.f32 %v1295_v40, %v1252_v6  ;;  %v1338_v46 = vpop.f32.mrf.mxu1  ;;  %1342 = vrot.lane.b32.xlu1 %v1294_v23, %s2154_s10 }
 0x1a3   : > { %v1373_v49 = vcombine.low %v1335_v25, %v1337_v34  ;;  %v1297_v42 = vpop.f32.mrf.mxu0 }
 0x1a4   : > { %v1357_v47 = vcombine.low %v1294_v23, %v1296_v41  ;;  %v1339_v52 = vpop.f32.mrf.mxu1  ;;  %1346 = vrot.lane.b32.xlu0 %v1296_v41, %s2154_s10  ;;  %v1808_v42 = vld [vmem:[%s2701_s4] sm:$0x3] }
 0x1a5   : > { %v1298_v57 = vpop.f32.mrf.mxu0  ;;  %v1380_v9 = vrot.slane %v1373_v49, %v2254_v14  ;;  %v1812_v49 = vsub.s32 0, %v2240_v5 }
 0x1a6   : > { %1350 = vrot.lane.b32.xlu1 %v1335_v25, %s2154_s10  ;;  %v1364_v4 = vrot.slane %v1357_v47, %v2254_v14 }
 0x1a7   : > { %v1813_v57 = vrot.slane %v1808_v42, %v1812_v49 }
 0x1a8   : > { %1354 = vrot.lane.b32.xlu0 %v1337_v34, %s2154_s10  ;;  %s1994_s10 = sshll.u32 %s2208_s22, 8  ;;  %s2156_s22 = smov [#allocation2]  }
 0x1a9   : > { %s1837_s16 = scalar_lea.hbm %s2702_s5, %s1994_s10  ;;  %s2093_s25 = sshll.u32 %s2156_s22, 4  ;;  %s2094_s25 = int_to_ptr.vmem [resolvable:$false] %s2093_s25 }
 0x1aa   : > { %s2095_s26 = scalar_lea.vmem %s2094_s25, 512  ;;  %p2096_p0 = scmp.lt.s32.totalorder %s1840_s13, %s2094_s25 }
 0x1ab   : > { %p2097_p1 = scmp.lt.s32.totalorder %s2095_s26, %s2089_s23 }
 0x1ad   : > { %p2098_p2 = por %p2097_p1, %p2096_p0 }
 0x1af   : > { %p2099_p3 = pnand %p2098_p2, %p2092_p13 }
 0x214   : > { %v1343_v56 = vpop.permute.xlu1 %1342 }
 0x216   : > { %v1347_v59 = vpop.permute.xlu0 %1346 }
 0x217   : > { %v1365_v62 = vcombine.low %v1343_v56, %v1347_v59 }
 0x218   : > { %v1351_v60 = vpop.permute.xlu1 %1350 }
 0x219   : > { %v1372_v53 = vrot.slane %v1365_v62, %v2254_v14  ;;  %v1817_v62 = vrot.slane %v1808_v42, %v1816_v51 }
 0x21a   : > { %v1355_v63 = vpop.permute.xlu0 %1354 }
 0x21b   : > { %v1381_v8 = vcombine.low %v1351_v60, %v1355_v63  ;;  %v1389_v17 = vcombine.low %v1364_v4, %v1372_v53  ;;  %v1390_v19 = vcombine.high %v1364_v4, %v1372_v53 }
 0x21d   : > { %v1388_v24 = vrot.slane %v1381_v8, %v2254_v14  ;;  %v1397_v35 = vrot.slane %v1389_v17, %v2271_v38  ;;  %v1404_v36 = vrot.slane %v1390_v19, %v2271_v38  ;;  %v2065_v14 = vld [vmem:[%s2700_s3 + $0xb0] ss:$8 sps:$4 sm:$0xff]  }
 0x21f   : > { %v1405_v27 = vcombine.low %v1380_v9, %v1388_v24  ;;  %v1406_v18 = vcombine.high %v1380_v9, %v1388_v24 }
 0x221   : > { %v1413_v11 = vrot.slane %v1405_v27, %v2271_v38  ;;  %v1420_v26 = vrot.slane %v1406_v18, %v2271_v38  ;;  %v2073_v38 = vld [vmem:[%s2700_s3 + $0xa4] ss:$8 sps:$4 sm:$0xff]  }
 0x223   : > { %v1421_v61 = vcombine.low %v1397_v35, %v1413_v11  ;;  %v1422_v1 = vcombine.high %v1397_v35, %v1413_v11  ;;  %v1423_v37 = vcombine.low %v1404_v36, %v1420_v26  ;;  %v1424_v7 = vcombine.high %v1404_v36, %v1420_v26 }
 0x225   : > { %v1425_v16 = vmax.f32 %v1421_v61, 0.0  ;;  %v1426_v32 = vmax.f32 %v1422_v1, 0.0  ;;  %v1427_v21 = vmax.f32 %v1423_v37, 0.0  ;;  %v1428_v23 = vmax.f32 %v1424_v7, 0.0 }
 0x227   : > { %v1429_v33 = vpack.c.bf16 %v1425_v16, %v1425_v16  ;;  %v1430_v44 = vpack.c.bf16 %v1426_v32, %v1426_v32  ;;  %v1431_v12 = vpack.c.bf16 %v1427_v21, %v1427_v21  ;;  %v1432_v29 = vpack.c.bf16 %v1428_v23, %v1428_v23 }
 0x229   : > { %1944 = vmatmul.mubr.msk.bf16.vlgmr.msra.gmra.mxu0 %vm1134_vm0, %v1430_v44  ;;  %1953 = vmatmul.mubr.msk.bf16.vlgmr.msra.gmra.mxu1 %vm1134_vm0, %v1429_v33 }
 0x22a   : > { %1679 = vmatpush1.bf16.msra.mxu0 %v2065_v14  ;;  %1774 = vmatpush1.bf16.msra.mxu1 %v2068_v39 }
 0x22b   : > { %1680 = vmatprep.subr.bf16.mxu0 %v2073_v38  ;;  %1775 = vmatprep.subr.bf16.mxu1 %v2076_v0 }
 0x22c   : > { %1702 = vmatprep.mubr.bf16.mxu0 %v2152_v3  ;;  %1797 = vmatprep.mubr.bf16.mxu1 %v2152_v3  ;;  %v2088_v3 = vld [vmem:[%s2700_s3 + $0xc4] ss:$8 sps:$4 sm:$0xff]  }
 0x22e   : > { %1681 = vmatpush1.bf16.msra.mxu0 %v2071_v2  ;;  %1776 = vmatpush1.bf16.msra.mxu1 %v2074_v45 }
 0x22f   : > { %1682 = vmatprep.subr.bf16.mxu0 %v2079_v43  ;;  %1777 = vmatprep.subr.bf16.mxu1 %v2082_v13 }
 0x232   : > { %1683 = vmatpush1.bf16.msra.mxu0 %v2077_v22  ;;  %1778 = vmatpush1.bf16.msra.mxu1 %v2080_v10 }
 0x233   : > { %1684 = vmatprep.subr.bf16.mxu0 %v2085_v28  ;;  %1779 = vmatprep.subr.bf16.mxu1 %v2088_v3 }
 0x236   : > { %1685 = vmatpush1.bf16.msra.mxu0 %v2083_v15  ;;  %1780 = vmatpush1.bf16.msra.mxu1 %v2086_v20 }
 0x239   : > { %1970 = vmatmul.mubr.msk.bf16.vlgmr.msra.gmra.mxu0 %vm1134_vm0, %v1431_v12  ;;  %1987 = vmatmul.mubr.msk.bf16.vlgmr.msra.gmra.mxu1 %vm1134_vm0, %v1432_v29 }
 0x2e9   : > { %v1527_v30 = vpop.f32.mrf.mxu0  ;;  %v1611_v31 = vpop.f32.mrf.mxu1 }
 0x2ea   : > { %v1612_v50 = vadd.f32 %v1611_v31, %v1527_v30 }
 0x2eb   : > { %v1529_v25 = vpop.f32.mrf.mxu0  ;;  %v1613_v34 = vpop.f32.mrf.mxu1 }
 0x2ec   : > { %v1614_v54 = vadd.f32 %v1613_v34, %v1529_v25 }
 0x2ed   : > { %v1531_v6 = vpop.f32.mrf.mxu0  ;;  %v1615_v40 = vpop.f32.mrf.mxu1 }
 0x2ef   : > { %v1532_v41 = vpop.f32.mrf.mxu0  ;;  %v1616_v46 = vpop.f32.mrf.mxu1 }
 0x2f9   : > { %v1704_v47 = vpop.f32.mrf.mxu0  ;;  %v1799_v52 = vpop.f32.mrf.mxu1 }
 0x2fa   : > { %v1711_v55 = vadd.f32 %v1704_v47, %v1612_v50 }
 0x2fb   : > { %v1706_v48 = vpop.f32.mrf.mxu0  ;;  %v1801_v58 = vpop.f32.mrf.mxu1 }
 0x2fc   : > { %v1806_v56 = vadd.f32 %v1799_v52, %v1711_v55  ;;  %v1712_v59 = vadd.f32 %v1706_v48, %v1614_v54 }
 0x2fd   : > { %v1708_v53 = vpop.f32.mrf.mxu0  ;;  %v1803_v60 = vpop.f32.mrf.mxu1 }
 0x2fe   : > { %v1820_v63 = vadd.f32 %v1813_v57, %v1806_v56  ;;  %v1807_v4 = vadd.f32 %v1801_v58, %v1712_v59 }
 0x2ff   : > { %v1709_v5 = vpop.f32.mrf.mxu0  ;;  %v1804_v8 = vpop.f32.mrf.mxu1 }
 0x300   : > { %1822 = vst [vmem:[%s220_s12] sm:$0xff] %v1820_v63  ;;  %v1821_v9 = vadd.f32 %v1817_v62, %v1807_v4 }
 0x302   : > { %1823 = vst [vmem:[%s220_s12 + $0x8] sm:$0xff] %v1821_v9 }
 0x303   : > { %2102 = shalt.err (!%p2099_p3)
}
 0x304   : > { %s2103_s30 = scalar_lea.hbm %s1837_s16, 256  ;;  %s2107_s8 = scalar_lea.hbm %s2702_s5, 512 }
 0x305   : > { %p2104_p4 = scmp.ne.s32.totalorder %s1837_s16, %s2103_s30  ;;  %p2108_p9 = scmp.lt.s32.totalorder %s1837_s16, %s2702_s5 }
 0x306   : > { %p2109_p10 = scmp.lt.s32.totalorder %s2107_s8, %s2103_s30 }
 0x307   : > { %p2105_p7 = pnand %p2104_p4, %p2225_p5 }
 0x308   : > { %p2110_p11 = por %p2109_p10, %p2108_p9 }
 0x309   : > { %p2106_p8 = pneg %p2105_p7 }
 0x30b   : > { %p2111_p12 = pnand %p2110_p11, %p2106_p8 }
 0x30d   : > { %2114 = shalt.err (!%p2111_p12)
}
 0x30e   : > { %1995 = dma.vmem_to_hbm [thread:$0]  (%p2225_p5), %s1840_s13, 256, %s1837_s16, %s1825_s17  }
 0x30f PF: > { %p2001_p13 = scmp.ge.s32.totalorder %s2149_s21, 2  ;;  %s1851_s10 = sand.u32 1, %s2137_s18  }
 0x310   : > { %s1852_s12 = scalar_lea.sflag [#allocation3], %s1851_s10 }
 0x311   : > { %p1998_p0 = pnand %p2001_p13, %p2229_p6 }
 0x313   : > { %p1999_p1 = pneg %p1998_p0 }
 0x315   : > { %2132 = dma.done.wait (%p1999_p1), %s1852_s12, 256  }
 0x316   : > { %2134 = vsyncadd (%p1999_p1), %s1852_s12, 4294967040  ;;  %p15_p2 = scmp.ge.s32.totalorder %s2212_s24, 4   ;;  %s2705_s18 = smov %s2141_s19 }
 0x317   : > { %s2706_s19 = smov %s2145_s20  ;;  %s2707_s20 = smov %s2223_s27 }
 0x318   : > { %s2708_s21 = smov %s2212_s24  ;;  %17 = sbr.rel (!%p15_p2) target bundleno = 3 (0x3), region = 78 }
 0x31d   :  { %1857 = vsyncpa [#allocation3], 1 }
 0x31e   :  { %1859 = vsyncpa [#allocation3 + $0x1], 1 }

</bundles_post_ra>
